<compile_context>
chip_gen: v5e
topology: v5e:2x2
jax: 0.10.0
libtpu: 0.0.40
codegen_flags: <defaults>
</compile_context>

<pallas_src>
import jax
import jax.numpy as jnp
from jax import lax
from jax.experimental import pallas as pl
from jax.experimental.pallas import tpu as pltpu


_CHUNK = 256  # rows per in-kernel multiply-reduce chunk (product = 32 f32 vregs)


def _round_up(n, m):
    return ((n + m - 1) // m) * m


def _round_down(n, m):
    return max(m, (n // m) * m)


def _generation_params():
    """(target x-tile bytes, vmem_limit_bytes) per TPU generation."""
    kind = ""
    try:
        kind = jax.devices()[0].device_kind.lower()
    except Exception:
        pass
    if "v7" in kind or "7x" in kind:
        # 3.2 TB/s HBM needs the biggest tiles, but only 64 MiB physical VMEM.
        return 12 * 1024 * 1024, 48 * 1024 * 1024
    if "v6" in kind:
        return 8 * 1024 * 1024, 64 * 1024 * 1024
    # v5e (scoped-VMEM default is only 16 MiB -> must raise explicitly) and unknown.
    return 4 * 1024 * 1024, 32 * 1024 * 1024


def logreg_kernel(x_ref, w_ref, b_ref, o_ref):
    # x_ref: (tile_b, D) VMEM     w_ref: (1, D) VMEM (resident across grid)
    # b_ref: (1,) SMEM scalar     o_ref: (tile_b, 1)
    tile_b = x_ref.shape[0]
    chunk = _CHUNK if tile_b % _CHUNK == 0 else tile_b
    n_chunks = tile_b // chunk

    w = w_ref[...].astype(jnp.float32)  # broadcast over sublane rows
    b = b_ref[0]

    def body(c, carry):
        r0 = pl.multiple_of(c * chunk, 8)
        xc = x_ref[pl.ds(r0, chunk), :].astype(jnp.float32)       # (chunk, D)
        logits = jnp.sum(xc * w, axis=-1, keepdims=True) + b      # VPU mul + XLU lane reduce
        y = pl.reciprocal(1.0 + jnp.exp(-logits), approx=False)   # exact sigmoid
        o_ref[pl.ds(r0, chunk), :] = y.astype(o_ref.dtype)
        return carry

    lax.fori_loop(0, n_chunks, body, 0,
                  unroll=(True if n_chunks <= 8 else 8))


def logistic_regression(x, weight, bias, *, tile_b=None):
    """x: [B, D], weight: [1, D] (PyTorch nn.Linear layout), bias: [1]."""
    B, D = x.shape
    itemsize = jnp.dtype(x.dtype).itemsize
    target_tile_bytes, vmem_limit = _generation_params()

    # Per-row VMEM cost of a grid step, double-buffered:
    #   x row (D * itemsize)  +  lane-padded (tile_b, 1) output row (128 lanes).
    per_row_vmem = 2 * (D * itemsize + 128 * itemsize)
    vmem_budget = vmem_limit - 4 * 1024 * 1024            # headroom (weight, scratch)
    cap_vmem = _round_down(vmem_budget // per_row_vmem, 8)
    cap_target = _round_down(max(8, target_tile_bytes // (D * itemsize)), 8)
    cap_batch = _round_up(B, 8)
    cap_two_steps = _round_up(pl.cdiv(B, 2), 8)            # >=2 grid steps for v7x dual-TC

    if tile_b is None:
        tile_b = min(cap_vmem, cap_target, cap_batch, cap_two_steps)
    else:
        tile_b = min(_round_down(max(8, tile_b), 8), cap_vmem, cap_batch)
    if tile_b >= _CHUNK:
        tile_b = _round_down(tile_b, _CHUNK)               # chunk loop divides evenly

    grid = (pl.cdiv(B, tile_b),)   # ragged last block: Pallas clips reads / masks writes

    cost = pl.CostEstimate(
        flops=2 * B * D,
        transcendentals=B,
        bytes_accessed=(B * D + D + 1) * itemsize + B * itemsize,
    )

    return pl.pallas_call(
        logreg_kernel,
        out_shape=jax.ShapeDtypeStruct((B, 1), x.dtype),
        grid=grid,
        in_specs=[
            pl.BlockSpec((tile_b, D), lambda i: (i, 0)),        # x: tiled over batch
            pl.BlockSpec((1, D), lambda i: (0, 0)),             # weight row: resident
            pl.BlockSpec(memory_space=pltpu.MemorySpace.SMEM),  # bias: SMEM scalar
        ],
        out_specs=pl.BlockSpec((tile_b, 1), lambda i: (i, 0)),
        compiler_params=pltpu.CompilerParams(
            dimension_semantics=("parallel",),   # shard batch tiles across TCs (v7x)
            vmem_limit_bytes=vmem_limit,
        ),
        cost_estimate=cost,
    )(x, weight, bias)


if __name__ == "__main__":
    key = jax.random.PRNGKey(0)
    kx, kw, kb = jax.random.split(key, 3)

    # Batch=200 (exercises the ragged last block, no padding copy), D=128
    # (lane-aligned feature dim).
    B, D = 200, 128
    bound = 1.0 / jnp.sqrt(jnp.float32(D))
    x = jax.random.normal(kx, (B, D), dtype=jnp.float32)
    weight = jax.random.uniform(kw, (1, D), jnp.float32, -bound, bound)
    bias = jax.random.uniform(kb, (1,), jnp.float32, -bound, bound)
    ref = 1.0 / (1.0 + jnp.exp(-(x @ weight.T + bias)))

    # Adaptive tile: capped at ceil(B/2) -> 2 grid steps, second block ragged.
    out = jax.block_until_ready(logistic_regression(x, weight, bias))
    assert out.shape == (B, 1)
    assert jnp.allclose(out, ref, atol=1e-5, rtol=1e-5)

    # Explicit small tile: 4 grid steps, ragged last block with 8 valid rows.
    out_small = jax.block_until_ready(logistic_regression(x, weight, bias, tile_b=64))
    assert jnp.allclose(out_small, ref, atol=1e-5, rtol=1e-5)

    # Original toy size (B=8, D=32): single tile; at this size launch overhead
    # dominates and plain XLA fusion would be preferable in practice.
    B2, D2 = 8, 32
    bound2 = 1.0 / jnp.sqrt(jnp.float32(D2))
    x2 = jax.random.normal(kx, (B2, D2), dtype=jnp.float32)
    w2 = jax.random.uniform(kw, (1, D2), jnp.float32, -bound2, bound2)
    b2 = jax.random.uniform(kb, (1,), jnp.float32, -bound2, bound2)
    out2 = jax.block_until_ready(logistic_regression(x2, w2, b2))
    ref2 = 1.0 / (1.0 + jnp.exp(-(x2 @ w2.T + b2)))
    assert out2.shape == (B2, 1)
    assert jnp.allclose(out2, ref2, atol=1e-5, rtol=1e-5)

    print("KERNEL_OK")
</pallas_src>

<mosaic_0001>
module attributes {stable_mosaic.version = 11 : i64} {
  func.func @logreg_kernel(%arg0: i32, %arg1: memref<104x128xf32, #tpu.memory_space<vmem>>, %arg2: memref<1x128xf32, #tpu.memory_space<vmem>>, %arg3: memref<1xf32, #tpu.memory_space<smem>>, %arg4: memref<104x1xf32, #tpu.memory_space<vmem>>) attributes {dimension_semantics = [#tpu.dimension_semantics<parallel>], iteration_bounds = array<i64: 2>, scalar_prefetch = 0 : i64, scratch_operands = 0 : i64, tpu.core_type = #tpu.core_type<tc>, window_params = [{transform_indices = @transform_0, window_bounds = array<i64: 104, 128>}, {pipeline_mode = #tpu.pipeline_mode<synchronous>, transform_indices = @transform_1, window_bounds = array<i64: 1, 128>}, {transform_indices = @transform_2, window_bounds = array<i64: 1>}, {transform_indices = @transform_3, window_bounds = array<i64: 104, 1>}]} {
    %c0 = arith.constant 0 : index
    %c0_0 = arith.constant 0 : index
    %0 = vector.load %arg2[%c0, %c0_0] : memref<1x128xf32, #tpu.memory_space<vmem>>, vector<1x128xf32>
    %c0_1 = arith.constant 0 : index
    %1 = memref.load %arg3[%c0_1] : memref<1xf32, #tpu.memory_space<smem>>
    %c0_i32 = arith.constant 0 : i32
    %c104_i32 = arith.constant 104 : i32
    %2 = arith.muli %c0_i32, %c104_i32 : i32
    %3 = tpu.assume_multiple %2, 8 : i32
    %4 = arith.index_cast %3 : i32 to index
    %c0_2 = arith.constant 0 : index
    %5 = vector.load %arg1[%4, %c0_2] : memref<104x128xf32, #tpu.memory_space<vmem>>, vector<104x128xf32>
    %6 = vector.broadcast %0 : vector<1x128xf32> to vector<104x128xf32>
    %7 = arith.mulf %5, %6 : vector<104x128xf32>
    %cst = arith.constant dense<0.000000e+00> : vector<104xf32>
    %8 = vector.multi_reduction <add>, %7, %cst [1] : vector<104x128xf32> to vector<104xf32>
    %9 = vector.shape_cast %8 : vector<104xf32> to vector<104x1xf32>
    %10 = vector.broadcast %1 : f32 to vector<104x1xf32>
    %11 = arith.addf %9, %10 : vector<104x1xf32>
    %cst_3 = arith.constant 0.000000e+00 : f32
    %12 = vector.broadcast %cst_3 : f32 to vector<104x1xf32>
    %13 = arith.subf %12, %11 : vector<104x1xf32>
    %14 = math.exp %13 : vector<104x1xf32>
    %cst_4 = arith.constant 1.000000e+00 : f32
    %15 = vector.broadcast %cst_4 : f32 to vector<104x1xf32>
    %16 = arith.addf %15, %14 : vector<104x1xf32>
    %17 = tpu.reciprocal %16 : vector<104x1xf32> -> vector<104x1xf32>
    %18 = arith.index_cast %3 : i32 to index
    %c0_5 = arith.constant 0 : index
    %19 = vector.load %arg4[%18, %c0_5] : memref<104x1xf32, #tpu.memory_space<vmem>>, vector<104x1xf32>
    tpu.vector_store %arg4[%18, %c0_5], %17 {strides = array<i32>} : memref<104x1xf32, #tpu.memory_space<vmem>>, vector<104x1xf32>,
    %c1_i32 = arith.constant 1 : i32
    return
  }
  func.func @transform_0(%arg0: i32) -> (i32, i32) {
    %c0_i32 = arith.constant 0 : i32
    %c0_i32_0 = arith.constant 0 : i32
    return %arg0, %c0_i32 : i32, i32
  }
  func.func @transform_1(%arg0: i32) -> (i32, i32) {
    %c0_i32 = arith.constant 0 : i32
    %c0_i32_0 = arith.constant 0 : i32
    %c0_i32_1 = arith.constant 0 : i32
    return %c0_i32, %c0_i32_0 : i32, i32
  }
  func.func @transform_2(%arg0: i32) -> i32 {
    %c0_i32 = arith.constant 0 : i32
    %c0_i32_0 = arith.constant 0 : i32
    return %c0_i32 : i32
  }
  func.func @transform_3(%arg0: i32) -> (i32, i32) {
    %c0_i32 = arith.constant 0 : i32
    %c0_i32_0 = arith.constant 0 : i32
    return %arg0, %c0_i32 : i32, i32
  }
}

</mosaic_0001>

<bundles_post_ra>
// kernel: tpu_custom_call.1
= control target key start
LH: loop header
LB: loop body
LE: loop exit
PB: predicated region body
PF: predicated region fallthrough
CT: control target
= control target key end

     0   :  { %s1535_s0 = inlined_call_operand.hbm [shape: f32[200,128], index: 0, kind: input, shape index: {}]   ;;  %s1536_s1 = inlined_call_operand.vmem [shape: f32[1,128], index: 1, kind: input, shape index: {}]   ;;  %s1537_s2 = inlined_call_operand.<no memory space> [shape: f32[1], index: 2, kind: input, shape index: {}]   ;;  %s1538_s3 = inlined_call_operand.vmem [shape: f32[200,1], index: 3, kind: output, shape index: {}]  }
   0x1   :  { %8 = sst [smem:[#allocation2]] %s1537_s2 }
   0x2   :  { %9 = vsyncpa [#allocation4], 0 }
   0x3   :  { %11 = vsyncpa [#allocation4 + $0x1], 0  ;;  %s1150_s14 = smov 0   ;;  %s1152_s15 = smov 0  }
   0x4   :  { %s1154_s16 = smov 0   ;;  %s1156_s17 = smov 0  }
   0x5 LB: > { %s1169_s2 = sadd.s32 4294967295, %s1090_s17   ;;  %s1172_s18 = sadd.s32 1, %s1090_s17   ;;  %s1090_s17 = sphi %s1156_s17, %s1562_s17   ;;  %s1086_s16 = sphi %s1154_s16, %s1561_s16   ;;  %s1082_s15 = sphi %s1152_s15, %s1560_s15   ;;  %s1078_s14 = sphi %s1150_s14, %s1559_s14  }
   0x6   : > { %s21_s19 = ssub.s32 %s1090_s17, %s1172_s18  ;;  %s24_s20 = sadd.s32 1, %s1086_s16 }
   0x7   : > { %p22_p0 = scmp.eq.s32.totalorder %s21_s19, 0  ;;  %p31_p1 = scmp.ne.s32.totalorder %s1086_s16, %s1082_s15 }
   0x8   : > { %p32_p2 = scmp.eq.s32.totalorder %s1090_s17, 0  ;;  %p37_p3 = scmp.ne.s32.totalorder %s1082_s15, %s1078_s14 }
   0x9   : > { %s1182_s21 = scalar_select %p22_p0, %s1086_s16, %s24_s20  }
   0xa   : > { %p33_p4 = por %p32_p2, %p31_p1  ;;  %p38_p5 = scmp.eq.s32.totalorder %s1169_s2, 0 }
   0xb   : > { %p103_p6 = scmp.eq.s32.totalorder %s1169_s2, 1  ;;  %p803_p9 = scmp.ge.s32.totalorder %s1090_s17, 2 }
   0xc   : > { %p1186_p7 = por %p38_p5, %p37_p3 }
   0xd   : > { %p1190_p8 = por %p103_p6, %p31_p1  ;;  %131 = sbr.rel (%p803_p9) target bundleno = 56 (0x38), region = 24 }
  0x12   : > { %134 = sbr.rel (!%p33_p4) target bundleno = 56 (0x38), region = 28  ;;  %s135_s24 = sand.u32 (%p33_p4), 1, %s1086_s16  }
  0x13   : > { %s140_s25 = smul.u32 (%p33_p4), 13, %s1090_s17  ;;  %s1200_s4 = scalar_lea.sflag (%p33_p4), [#allocation4], %s135_s24 }
  0x14   : > { %s824_s26 = smul.u32 (%p33_p4), 104, %s135_s24 }
  0x15   : > { %s141_s27 = ssub.s32 (%p33_p4), 25, %s140_s25 }
  0x16   : > { %p142_p10 = scmp.lt.s32.totalorder (%p33_p4), %s141_s27, 13  ;;  %s139_s5 = scalar_lea.vmem (%p33_p4), [#allocation3], %s824_s26 }
  0x18   : > { %s1564_s27 = smov (!%p142_p10, %s141_s27), 13 }
  0x19   : > { %s804_s28 = sshll.u32 %s1564_s27, 3 }
  0x1a   : > { %s145_s29 = ssub.s32 104, %s804_s28 }
  0x1b   : > { %s146_s30 = sshll.u32 %s145_s29, 4 }
  0x1c   : > { %147 = vsyncadd %s1200_s4, %s146_s30  ;;  %p1203_p11 = scmp.ne.s32.totalorder %s804_s28, 0  ;;  %s822_s7 = smul.u32 104, %s1090_s17 }
  0x1d   : > { %s1208_s8 = sshll.u32 %s139_s5, 4  ;;  %s808_s9 = sshll.u32 %s1564_s27, 7  ;;  %s155_s8 = int_to_ptr.vmem [resolvable:$true] %s1208_s8 }
  0x1e   : > { %s150_s12 = scalar_lea.hbm %s1535_s0, %s822_s7  ;;  %s987_s19 = sshrl.u32 %s808_s9, 4 }
  0x1f   : > { %s152_s13 = sshll.u32 %s150_s12, 4  ;;  %s996_s26 = scalar_lea.hbm %s1535_s0, 200  ;;  %s1215_s13 = int_to_ptr.hbm [resolvable:$true] %s152_s13 }
  0x20   : > { %s985_s14 = sshra.s32 %s1215_s13, 4  ;;  %s986_s14 = int_to_ptr.hbm [resolvable:$true] %s985_s14 }
  0x21   : > { %s992_s20 = scalar_lea.hbm %s986_s14, %s987_s19  ;;  %p997_p1 = scmp.lt.s32.totalorder %s986_s14, %s1535_s0 }
  0x22   : > { %p993_p12 = scmp.ne.s32.totalorder %s986_s14, %s992_s20  ;;  %p998_p2 = scmp.lt.s32.totalorder %s996_s26, %s992_s20 }
  0x24   : > { %p994_p13 = pnand %p993_p12, %p1203_p11  ;;  %p999_p3 = por %p998_p2, %p997_p1 }
  0x26   : > { %p995_p0 = pneg %p994_p13 }
  0x28   : > { %p1000_p4 = pnand %p999_p3, %p995_p0 }
  0x2a   : > { %1003 = shalt.err (!%p1000_p4)
}
  0x2b   : > { %s1004_s30 = sshra.s32 %s155_s8, 4  ;;  %s1124_s7 = smov [#allocation3]   ;;  %s1005_s30 = int_to_ptr.vmem [resolvable:$true] %s1004_s30 }
  0x2c   : > { %s1011_s5 = scalar_lea.vmem %s1005_s30, %s987_s19  ;;  %s1015_s10 = scalar_lea.vmem %s1124_s7, 208 }
  0x2d   : > { %p1012_p5 = scmp.ne.s32.totalorder %s1005_s30, %s1011_s5  ;;  %p1017_p10 = scmp.lt.s32.totalorder %s1015_s10, %s1011_s5 }
  0x2f   : > { %p1013_p6 = pnand %p1012_p5, %p1203_p11 }
  0x31   : > { %p1014_p9 = pneg %p1013_p6 }
  0x33   : > { %p1019_p12 = pnand %p1017_p10, %p1014_p9 }
  0x35   : > { %1022 = shalt.err (!%p1019_p12)
}
  0x36   : > { %s1125_s11 = smov 128   ;;  %s1126_s12 = smov 8  }
  0x37   : > { %160 = dma.hbm_to_vmem [thread:$0]  (%p1203_p11), %s1215_s13, %s808_s9, %s155_s8, %s1200_s4, %s1125_s11, %s1125_s11, %s1126_s12  }
  0x38 PF: > { %p809_p13 = scmp.ge.s32.totalorder %s1090_s17, 1  ;;  %p162_p0 = scmp.lt.s32.totalorder %s1090_s17, 3 }
  0x3a   : > { %p163_p1 = pnand %p809_p13, %p162_p0 }
  0x3b   : > { %s168_s14 = sand.u32 (!%p163_p1), 1, %s1082_s15  }
  0x3c   : > { %166 = sbr.rel (%p163_p1) target bundleno = 321 (0x141), region = 32  ;;  %s169_s20 = scalar_lea.sflag (!%p163_p1), [#allocation4], %s168_s14 }
  0x3d   : > { %s1243_s19 = smul.u32 (!%p163_p1), 104, %s168_s14 }
  0x3f   : > { %s1246_s24 = scalar_lea.vmem (!%p163_p1), [#allocation3], %s1243_s19 }
  0x41   : > { %1073 = dma.done.wait (%p1186_p7), %s169_s20, 1664  }
  0x42   : > { %1075 = vsyncadd (%p1186_p7), %s169_s20, 4294965632  ;;  %v211_v0 = vld [vmem:[%s1246_s24 + $0x20] sm:$0xff]  ;;  %v209_v2 = vld [vmem:[%s1246_s24 + $0x10] sm:$0xff]  ;;  %s206_s22 = sld [smem:[#allocation2]]  ;;  %vm510_vm0 = vcmask 7168   ;;  %s1339_s4 = scalar_lea.vmem [#allocation5], %s1243_s19  }
  0x43   : > { %v926_v1 = vld [vmem:[%s1536_s1] ss:$0 sm:$0xff]  ;;  %v212_v7 = vld [vmem:[%s1246_s24 + $0x28] sm:$0xff]  ;;  %v213_v15 = vld [vmem:[%s1246_s24 + $0x30] sm:$0xff]  ;;  %s531_s6 = smul.u32 (%p1190_p8), 13, %s1169_s2 }
  0x44   : > { %v207_v3 = vld [vmem:[%s1246_s24] sm:$0xff]  ;;  %v227_v4 = vmul.f32 %v926_v1, %v211_v0  ;;  %v225_v5 = vmul.f32 %v926_v1, %v209_v2  ;;  %v210_v8 = vld [vmem:[%s1246_s24 + $0x18] sm:$0xff]  ;;  %v208_v9 = vld [vmem:[%s1246_s24 + $0x8] sm:$0xff]  ;;  %v228_v10 = vmul.f32 %v926_v1, %v212_v7  ;;  %v229_v18 = vmul.f32 %v926_v1, %v213_v15  ;;  %s823_s8 = smul.u32 (%p1190_p8), 104, %s1169_s2 }
  0x45   : > { %v223_v6 = vmul.f32 %v926_v1, %v207_v3  ;;  %v226_v11 = vmul.f32 %v926_v1, %v210_v8  ;;  %v224_v12 = vmul.f32 %v926_v1, %v208_v9  ;;  %v215_v13 = vld [vmem:[%s1246_s24 + $0x40] sm:$0xff]  ;;  %v214_v14 = vld [vmem:[%s1246_s24 + $0x38] sm:$0xff]  ;;  %v217_v20 = vld [vmem:[%s1246_s24 + $0x50] sm:$0xff]  ;;  %s532_s9 = ssub.s32 (%p1190_p8), 25, %s531_s6 }
  0x46   : > { %244 = vadd.xlane.f32.xlu2 %v227_v4  ;;  %240 = vadd.xlane.f32.xlu1 %v225_v5  ;;  %v231_v16 = vmul.f32 %v926_v1, %v215_v13  ;;  %v230_v17 = vmul.f32 %v926_v1, %v214_v14  ;;  %v218_v19 = vld [vmem:[%s1246_s24 + $0x58] sm:$0xff]  ;;  %v216_v21 = vld [vmem:[%s1246_s24 + $0x48] sm:$0xff]  ;;  %v233_v23 = vmul.f32 %v926_v1, %v217_v20  ;;  %v219_v25 = vld [vmem:[%s1246_s24 + $0x60] sm:$0xff]  ;;  %p533_p7 = scmp.lt.s32.totalorder (%p1190_p8), %s532_s9, 13  ;;  %s1446_s26 = scalar_lea.vmem (%p1190_p8), %s1538_s3, %s823_s8  }
  0x47   : > { %236 = vadd.xlane.f32.xlu0 %v223_v6  ;;  %v234_v22 = vmul.f32 %v926_v1, %v218_v19  ;;  %v232_v24 = vmul.f32 %v926_v1, %v216_v21  ;;  %v235_v26 = vmul.f32 %v926_v1, %v219_v25 }
  0x48   : > { %v1268_v27 = vstv %s206_s22 }
  0x4e   : > { %246 = vadd.xlane.f32.xlu2 %v228_v10  ;;  %242 = vadd.xlane.f32.xlu1 %v226_v11 }
  0x4f   : > { %238 = vadd.xlane.f32.xlu0 %v224_v12 }
  0x56   : > { %252 = vadd.xlane.f32.xlu2 %v231_v16  ;;  %250 = vadd.xlane.f32.xlu1 %v230_v17 }
  0x57   : > { %248 = vadd.xlane.f32.xlu0 %v229_v18 }
  0x5e   : > { %258 = vadd.xlane.f32.xlu2 %v234_v22  ;;  %256 = vadd.xlane.f32.xlu1 %v233_v23 }
  0x5f   : > { %254 = vadd.xlane.f32.xlu0 %v232_v24 }
  0x67   : > { %260 = vadd.xlane.f32.xlu0 %v235_v26 }
  0xb9   : > { %v245_v28 = vpop.xlane.xlu2 %244  ;;  %v241_v29 = vpop.xlane.xlu1 %240 }
  0xba   : > { %v267_v30 = vadd.f32 %v1268_v27, %v245_v28  ;;  %v265_v31 = vadd.f32 %v1268_v27, %v241_v29  ;;  %v237_v32 = vpop.xlane.xlu0 %236 }
  0xbb   : > { %v263_v33 = vadd.f32 %v1268_v27, %v237_v32 }
  0xbc   : > { %v280_v34 = vsub.f32 0.0, %v267_v30  ;;  %v278_v35 = vsub.f32 0.0, %v265_v31 }
  0xbd   : > { %v276_v36 = vsub.f32 0.0, %v263_v33 }
  0xbe   : > { %v297_v37 = vmul.f32 1.442695, %v280_v34  ;;  %v293_v38 = vmul.f32 1.442695, %v278_v35 }
  0xbf   : > { %v289_v39 = vmul.f32 1.442695, %v276_v36 }
  0xc0   : > { %927 = vpow2.f32 %v297_v37 }
  0xc1   : > { %929 = vpow2.f32 %v293_v38  ;;  %v247_v40 = vpop.xlane.xlu2 %246  ;;  %v243_v41 = vpop.xlane.xlu1 %242 }
  0xc2   : > { %931 = vpow2.f32 %v289_v39  ;;  %v268_v42 = vadd.f32 %v1268_v27, %v247_v40  ;;  %v266_v43 = vadd.f32 %v1268_v27, %v243_v41  ;;  %v239_v44 = vpop.xlane.xlu0 %238 }
  0xc3   : > { %v264_v45 = vadd.f32 %v1268_v27, %v239_v44 }
  0xc4   : > { %v281_v46 = vsub.f32 0.0, %v268_v42  ;;  %v279_v47 = vsub.f32 0.0, %v266_v43 }
  0xc5   : > { %v277_v48 = vsub.f32 0.0, %v264_v45 }
  0xc6   : > { %v928_v49 = vpop.eup %927  ;;  %v299_v50 = vmul.f32 1.442695, %v281_v46  ;;  %v295_v53 = vmul.f32 1.442695, %v279_v47 }
  0xc7   : > { %v930_v51 = vpop.eup %929  ;;  %v1276_v52 = vadd.f32 1.0, %v928_v49  ;;  %v291_v56 = vmul.f32 1.442695, %v277_v48 }
  0xc8   : > { %v932_v54 = vpop.eup %931  ;;  %v1278_v55 = vadd.f32 1.0, %v930_v51  ;;  %933 = vpow2.f32 %v299_v50 }
  0xc9   : > { %935 = vrcp.f32 %v1276_v52  ;;  %v253_v57 = vpop.xlane.xlu2 %252  ;;  %v1282_v58 = vadd.f32 1.0, %v932_v54  ;;  %v393_v59 = vand.u32 2147483647, %v1276_v52  ;;  %v395_v60 = vand.u32 2147483648, %v1276_v52  ;;  %v251_v62 = vpop.xlane.xlu1 %250 }
  0xca   : > { %937 = vrcp.f32 %v1278_v55  ;;  %v271_v61 = vadd.f32 %v1268_v27, %v253_v57  ;;  %v365_v63 = vand.u32 2147483647, %v1278_v55  ;;  %v367_v0 = vand.u32 2147483648, %v1278_v55  ;;  %v249_v3 = vpop.xlane.xlu0 %248 }
  0xcb   : > { %939 = vpow2.f32 %v295_v53  ;;  %vm389_vm1 = vweird.f32 %v1276_v52  ;;  %vm361_vm2 = vweird.f32 %v1278_v55  ;;  %v270_v6 = vadd.f32 %v1268_v27, %v251_v62 }
  0xcc   : > { %941 = vpow2.f32 %v291_v56  ;;  %v284_v2 = vsub.f32 0.0, %v271_v61  ;;  %vm1296_vm3 = vcmp.eq.f32.partialorder %v393_v59, 8.507059e+37  ;;  %v396_v10 = vor.u32 1.1754944e-38, %v395_v60 }
  0xcd   : > { %943 = vrcp.f32 %v1282_v58  ;;  %vm1301_vm4 = vcmp.eq.f32.partialorder %v365_v63, 8.507059e+37  ;;  %v368_v15 = vor.u32 1.1754944e-38, %v367_v0  ;;  %v337_v16 = vand.u32 2147483647, %v1282_v58 }
  0xce   : > { %v934_v1 = vpop.eup %933  ;;  %v305_v11 = vmul.f32 1.442695, %v284_v2  ;;  %vm333_vm5 = vweird.f32 %v1282_v58  ;;  %v339_v19 = vand.u32 2147483648, %v1282_v58  ;;  %v1312_v21 = vadd.f32 %v1268_v27, %v249_v3 }
  0xcf   : > { %v936_v4 = vpop.eup %935  ;;  %v1292_v5 = vadd.f32 1.0, %v934_v1  ;;  %v283_v25 = vsub.f32 0.0, %v270_v6  ;;  %vm1320_vm8 = vcmp.eq.f32.partialorder %v337_v16, 8.507059e+37 }
  0xd0   : > { %v938_v7 = vpop.eup %937  ;;  %v385_v8 = vmul.f32 %v936_v4, %v1276_v52  ;;  %vm390_vm6 = vweird.f32 %v936_v4  ;;  %v340_v35 = vor.u32 1.1754944e-38, %v339_v19  ;;  %v282_v54 = vsub.f32 0.0, %v1312_v21 }
  0xd1   : > { %v940_v12 = vpop.eup %939  ;;  %v357_v13 = vmul.f32 %v938_v7, %v1278_v55  ;;  %945 = vrcp.f32 %v1292_v5  ;;  %vm362_vm7 = vweird.f32 %v938_v7  ;;  %v407_v30 = vand.u32 2147483647, %v1292_v5  ;;  %vm391_vm9 = vmor %vm389_vm1, %vm390_vm6  ;;  %v259_v59 = vpop.xlane.xlu2 %258 }
  0xd2   : > { %v942_v17 = vpop.eup %941  ;;  %v386_v18 = vsub.f32 1.0, %v385_v8  ;;  %v1309_v20 = vadd.f32 1.0, %v940_v12  ;;  %947 = vpow2.f32 %v305_v11  ;;  %v409_v31 = vand.u32 2147483648, %v1292_v5  ;;  %vm363_vm11 = vmor %vm361_vm2, %vm362_vm7  ;;  %v255_v42 = vpop.xlane.xlu0 %254 }
  0xd3   : > { %v944_v22 = vpop.eup %943  ;;  %v358_v23 = vsub.f32 1.0, %v357_v13  ;;  %v1314_v24 = vadd.f32 1.0, %v942_v17  ;;  %vm403_vm10 = vweird.f32 %v1292_v5  ;;  %v303_v38 = vmul.f32 1.442695, %v283_v25  ;;  %v257_v62 = vpop.xlane.xlu1 %256 }
  0xd4   : > { %v387_v26 = vmul.f32 %v936_v4, %v386_v18  ;;  %v329_v28 = vmul.f32 %v944_v22, %v1282_v58  ;;  %949 = vrcp.f32 %v1309_v20  ;;  %vm334_vm12 = vweird.f32 %v944_v22 }
  0xd5   : > { %v359_v29 = vmul.f32 %v938_v7, %v358_v23  ;;  %951 = vrcp.f32 %v1314_v24  ;;  %vm1334_vm13 = vcmp.eq.f32.partialorder %v407_v30, 8.507059e+37  ;;  %v410_v47 = vor.u32 1.1754944e-38, %v409_v31  ;;  %vm335_vm15 = vmor %vm333_vm5, %vm334_vm12 }
  0xd6   : > { %v388_v32 = vadd.f32 %v936_v4, %v387_v26  ;;  %v330_v33 = vsub.f32 1.0, %v329_v28  ;;  %vm375_vm14 = vweird.f32 %v1309_v20  ;;  %v379_v52 = vand.u32 2147483647, %v1309_v20 }
  0xd7   : > { %v946_v36 = vpop.eup %945  ;;  %v360_v37 = vadd.f32 %v938_v7, %v359_v29  ;;  %953 = vpow2.f32 %v303_v38  ;;  %v381_v58 = vand.u32 2147483648, %v1309_v20  ;;  %vm347_vm2 = vweird.f32 %v1314_v24 }
  0xd8   : > { %v392_v39 = vsel %vm391_vm9, %v936_v4, %v388_v32  ;;  %v331_v40 = vmul.f32 %v944_v22, %v330_v33  ;;  %v399_v41 = vmul.f32 %v946_v36, %v1292_v5  ;;  %v948_v43 = vpop.eup %947  ;;  %vm404_vm1 = vweird.f32 %v946_v36 }
  0xd9   : > { %v397_v44 = vsel %vm1296_vm3, %v396_v10, %v392_v39  ;;  %v364_v45 = vsel %vm363_vm11, %v938_v7, %v360_v37  ;;  %v1352_v53 = vadd.f32 1.0, %v948_v43  ;;  %v351_v2 = vand.u32 2147483647, %v1314_v24  ;;  %vm405_vm3 = vmor %vm403_vm10, %vm404_vm1 }
  0xda   : > { %515 = vst.msk [vmem:[%s1339_s4 + $0x20] sm:$0xff] %vm510_vm0, %v397_v44  ;;  %v369_v48 = vsel %vm1301_vm4, %v368_v15, %v364_v45  ;;  %v332_v49 = vadd.f32 %v944_v22, %v331_v40  ;;  %v400_v50 = vsub.f32 1.0, %v399_v41  ;;  %v950_v51 = vpop.eup %949  ;;  %v353_v3 = vand.u32 2147483648, %v1314_v24  ;;  %v261_v17 = vpop.xlane.xlu0 %260 }
  0xdb   : > { %513 = vst.msk [vmem:[%s1339_s4 + $0x10] sm:$0xff] %vm510_vm0, %v369_v48  ;;  %v371_v57 = vmul.f32 %v950_v51, %v1309_v20  ;;  %v952_v60 = vpop.eup %951  ;;  %955 = vrcp.f32 %v1352_v53  ;;  %vm376_vm4 = vweird.f32 %v950_v51  ;;  %v301_v4 = vmul.f32 1.442695, %v282_v54 }
  0xdc   : > { %v336_v55 = vsel %vm335_vm15, %v944_v22, %v332_v49  ;;  %v401_v56 = vmul.f32 %v946_v36, %v400_v50  ;;  %v343_v1 = vmul.f32 %v952_v60, %v1314_v24  ;;  %v274_v6 = vadd.f32 %v1268_v27, %v259_v59  ;;  %vm377_vm7 = vmor %vm375_vm14, %vm376_vm4 }
  0xdd   : > { %v341_v61 = vsel %vm1320_vm8, %v340_v35, %v336_v55  ;;  %v372_v0 = vsub.f32 1.0, %v371_v57  ;;  %v273_v10 = vadd.f32 %v1268_v27, %v257_v62  ;;  %v954_v11 = vpop.eup %953  ;;  %vm1372_vm5 = vcmp.eq.f32.partialorder %v379_v52, 8.507059e+37 }
  0xde   : > { %511 = vst.msk [vmem:[%s1339_s4] sm:$0xff] %vm510_vm0, %v341_v61  ;;  %v402_v63 = vadd.f32 %v946_v36, %v401_v56  ;;  %v344_v9 = vsub.f32 1.0, %v343_v1  ;;  %vm348_vm6 = vweird.f32 %v952_v60  ;;  %957 = vpow2.f32 %v301_v4 }
  0xdf   : > { %v373_v8 = vmul.f32 %v950_v51, %v372_v0  ;;  %v1378_v15 = vadd.f32 1.0, %v954_v11  ;;  %v287_v16 = vsub.f32 0.0, %v274_v6  ;;  %v382_v19 = vor.u32 1.1754944e-38, %v381_v58  ;;  %vm349_vm9 = vmor %vm347_vm2, %vm348_vm6 }
  0xe0   : > { %v406_v7 = vsel %vm405_vm3, %v946_v36, %v402_v63  ;;  %v345_v14 = vmul.f32 %v952_v60, %v344_v9  ;;  %vm1383_vm8 = vcmp.eq.f32.partialorder %v351_v2, 8.507059e+37  ;;  %v286_v22 = vsub.f32 0.0, %v273_v10 }
  0xe1   : > { %v411_v12 = vsel %vm1334_vm13, %v410_v47, %v406_v7  ;;  %v374_v5 = vadd.f32 %v950_v51, %v373_v8  ;;  %v956_v18 = vpop.eup %955  ;;  %v272_v23 = vadd.f32 %v1268_v27, %v255_v42  ;;  %v354_v28 = vor.u32 1.1754944e-38, %v353_v3 }
  0xe2   : > { %516 = vst.msk [vmem:[%s1339_s4 + $0x28] sm:$0xff] %vm510_vm0, %v411_v12  ;;  %v346_v26 = vadd.f32 %v952_v60, %v345_v14  ;;  %v441_v29 = vmul.f32 %v956_v18, %v1352_v53  ;;  %vm445_vm10 = vweird.f32 %v1352_v53  ;;  %959 = vrcp.f32 %v1378_v15 }
  0xe3   : > { %v378_v25 = vsel %vm377_vm7, %v950_v51, %v374_v5  ;;  %v275_v20 = vadd.f32 %v1268_v27, %v261_v17  ;;  %v449_v33 = vand.u32 2147483647, %v1352_v53  ;;  %v311_v34 = vmul.f32 1.442695, %v287_v16 }
  0xe4   : > { %v383_v30 = vsel %vm1372_vm5, %v382_v19, %v378_v25  ;;  %v350_v31 = vsel %vm349_vm9, %v952_v60, %v346_v26  ;;  %v442_v32 = vsub.f32 1.0, %v441_v29  ;;  %v958_v35 = vpop.eup %957  ;;  %v451_v24 = vand.u32 2147483648, %v1352_v53 }
  0xe5   : > { %514 = vst.msk [vmem:[%s1339_s4 + $0x18] sm:$0xff] %vm510_vm0, %v383_v30  ;;  %v355_v36 = vsel %vm1383_vm8, %v354_v28, %v350_v31  ;;  %v309_v37 = vmul.f32 1.442695, %v286_v22  ;;  %v285_v38 = vsub.f32 0.0, %v272_v23  ;;  %vm446_vm11 = vweird.f32 %v956_v18 }
  0xe6   : > { %512 = vst.msk [vmem:[%s1339_s4 + $0x8] sm:$0xff] %vm510_vm0, %v355_v36  ;;  %v443_v39 = vmul.f32 %v956_v18, %v442_v32  ;;  %v321_v27 = vadd.f32 1.0, %v958_v35  ;;  %961 = vpow2.f32 %v311_v34  ;;  %v288_v41 = vsub.f32 0.0, %v275_v20  ;;  %vm447_vm12 = vmor %vm445_vm10, %vm446_vm11 }
  0xe7   : > { %963 = vpow2.f32 %v309_v37  ;;  %v307_v40 = vmul.f32 1.442695, %v285_v38  ;;  %v452_v44 = vor.u32 1.1754944e-38, %v451_v24  ;;  %vm450_vm13 = vcmp.eq.f32.partialorder %v449_v33, 8.507059e+37 }
  0xe8   : > { %v444_v42 = vadd.f32 %v956_v18, %v443_v39  ;;  %965 = vrcp.f32 %v321_v27  ;;  %v960_v43 = vpop.eup %959  ;;  %v313_v45 = vmul.f32 1.442695, %v288_v41  ;;  %vm431_vm14 = vweird.f32 %v1378_v15 }
  0xe9   : > { %967 = vpow2.f32 %v307_v40  ;;  %v427_v47 = vmul.f32 %v960_v43, %v1378_v15  ;;  %v437_v52 = vand.u32 2147483648, %v1378_v15  ;;  %vm432_vm15 = vweird.f32 %v960_v43 }
  0xea   : > { %v448_v46 = vsel %vm447_vm12, %v956_v18, %v444_v42  ;;  %969 = vpow2.f32 %v313_v45  ;;  %v435_v56 = vand.u32 2147483647, %v1378_v15  ;;  %vm433_vm1 = vmor %vm431_vm14, %vm432_vm15  ;;  %v423_v1 = vand.u32 2147483648, %v321_v27 }
  0xeb   : > { %v453_v48 = vsel %vm450_vm13, %v452_v44, %v448_v46  ;;  %v428_v50 = vsub.f32 1.0, %v427_v47  ;;  %v438_v58 = vor.u32 1.1754944e-38, %v437_v52  ;;  %v421_v6 = vand.u32 2147483647, %v321_v27 }
  0xec   : > { %v962_v49 = vpop.eup %961  ;;  %519 = vst.msk [vmem:[%s1339_s4 + $0x40] sm:$0xff] %vm510_vm0, %v453_v48  ;;  %vm436_vm2 = vcmp.eq.f32.partialorder %v435_v56, 8.507059e+37  ;;  %vm417_vm4 = vweird.f32 %v321_v27  ;;  %v424_v11 = vor.u32 1.1754944e-38, %v423_v1 }
  0xed   : > { %v964_v51 = vpop.eup %963  ;;  %v326_v53 = vadd.f32 1.0, %v962_v49  ;;  %v429_v55 = vmul.f32 %v960_v43, %v428_v50  ;;  %vm422_vm6 = vcmp.eq.f32.partialorder %v421_v6, 8.507059e+37 }
  0xee   : > { %v966_v54 = vpop.eup %965  ;;  %v325_v57 = vadd.f32 1.0, %v964_v51 }
  0xef   : > { %v968_v59 = vpop.eup %967  ;;  %v413_v60 = vmul.f32 %v966_v54, %v321_v27  ;;  %971 = vrcp.f32 %v326_v53  ;;  %v430_v61 = vadd.f32 %v960_v43, %v429_v55  ;;  %vm418_vm3 = vweird.f32 %v966_v54 }
  0xf0   : > { %973 = vrcp.f32 %v325_v57  ;;  %v970_v63 = vpop.eup %969  ;;  %v1413_v2 = vadd.f32 1.0, %v968_v59  ;;  %vm419_vm5 = vmor %vm417_vm4, %vm418_vm3  ;;  %v491_v16 = vand.u32 2147483647, %v326_v53  ;;  %v493_v17 = vand.u32 2147483648, %v326_v53 }
  0xf1   : > { %v414_v62 = vsub.f32 1.0, %v413_v60  ;;  %v434_v0 = vsel %vm433_vm1, %v960_v43, %v430_v61  ;;  %v1418_v9 = vadd.f32 1.0, %v970_v63  ;;  %v477_v19 = vand.u32 2147483647, %v325_v57 }
  0xf2   : > { %v439_v3 = vsel %vm436_vm2, %v438_v58, %v434_v0  ;;  %975 = vrcp.f32 %v1413_v2  ;;  %v479_v21 = vand.u32 2147483648, %v325_v57  ;;  %vm487_vm7 = vweird.f32 %v326_v53 }
  0xf3   : > { %v415_v4 = vmul.f32 %v966_v54, %v414_v62  ;;  %518 = vst.msk [vmem:[%s1339_s4 + $0x38] sm:$0xff] %vm510_vm0, %v439_v3  ;;  %977 = vrcp.f32 %v1418_v9  ;;  %vm473_vm9 = vweird.f32 %v325_v57  ;;  %vm492_vm11 = vcmp.eq.f32.partialorder %v491_v16, 8.507059e+37 }
  0xf4   : > { %v494_v29 = vor.u32 1.1754944e-38, %v493_v17  ;;  %vm478_vm13 = vcmp.eq.f32.partialorder %v477_v19, 8.507059e+37  ;;  %v480_v31 = vor.u32 1.1754944e-38, %v479_v21  ;;  %v463_v34 = vand.u32 2147483647, %v1413_v2 }
  0xf5   : > { %v972_v7 = vpop.eup %971  ;;  %v416_v8 = vadd.f32 %v966_v54, %v415_v4  ;;  %v465_v35 = vand.u32 2147483648, %v1413_v2  ;;  %vm459_vm1 = vweird.f32 %v1413_v2  ;;  %v507_v41 = vand.u32 2147483648, %v1418_v9 }
  0xf6   : > { %v974_v10 = vpop.eup %973  ;;  %v483_v12 = vmul.f32 %v972_v7, %v326_v53  ;;  %vm488_vm8 = vweird.f32 %v972_v7  ;;  %v505_v44 = vand.u32 2147483647, %v1418_v9  ;;  %vm464_vm4 = vcmp.eq.f32.partialorder %v463_v34, 8.507059e+37 }
  0xf7   : > { %v420_v13 = vsel %vm419_vm5, %v966_v54, %v416_v8  ;;  %v469_v5 = vmul.f32 %v974_v10, %v325_v57  ;;  %vm474_vm10 = vweird.f32 %v974_v10  ;;  %vm489_vm12 = vmor %vm487_vm7, %vm488_vm8  ;;  %v466_v42 = vor.u32 1.1754944e-38, %v465_v35 }
  0xf8   : > { %v425_v14 = vsel %vm422_vm6, %v424_v11, %v420_v13  ;;  %v484_v15 = vsub.f32 1.0, %v483_v12  ;;  %v976_v22 = vpop.eup %975  ;;  %vm475_vm14 = vmor %vm473_vm9, %vm474_vm10  ;;  %vm501_vm5 = vweird.f32 %v1418_v9  ;;  %v508_v48 = vor.u32 1.1754944e-38, %v507_v41 }
  0xf9   : > { %517 = vst.msk [vmem:[%s1339_s4 + $0x30] sm:$0xff] %vm510_vm0, %v425_v14  ;;  %v470_v18 = vsub.f32 1.0, %v469_v5  ;;  %v455_v26 = vmul.f32 %v976_v22, %v1413_v2  ;;  %v978_v30 = vpop.eup %977  ;;  %vm460_vm15 = vweird.f32 %v976_v22  ;;  %vm506_vm7 = vcmp.eq.f32.partialorder %v505_v44, 8.507059e+37 }
  0xfa   : > { %v485_v23 = vmul.f32 %v972_v7, %v484_v15  ;;  %v497_v36 = vmul.f32 %v978_v30, %v1418_v9  ;;  %vm461_vm2 = vmor %vm459_vm1, %vm460_vm15  ;;  %vm502_vm3 = vweird.f32 %v978_v30 }
  0xfb   : > { %v471_v25 = vmul.f32 %v974_v10, %v470_v18  ;;  %v456_v32 = vsub.f32 1.0, %v455_v26  ;;  %vm503_vm6 = vmor %vm501_vm5, %vm502_vm3 }
  0xfc   : > { %v486_v28 = vadd.f32 %v972_v7, %v485_v23  ;;  %v498_v27 = vsub.f32 1.0, %v497_v36 }
  0xfd   : > { %v472_v20 = vadd.f32 %v974_v10, %v471_v25  ;;  %v457_v38 = vmul.f32 %v976_v22, %v456_v32 }
  0xfe   : > { %v490_v33 = vsel %vm489_vm12, %v972_v7, %v486_v28  ;;  %v499_v43 = vmul.f32 %v978_v30, %v498_v27 }
  0xff   : > { %v495_v24 = vsel %vm492_vm11, %v494_v29, %v490_v33  ;;  %v476_v37 = vsel %vm475_vm14, %v974_v10, %v472_v20  ;;  %v458_v40 = vadd.f32 %v976_v22, %v457_v38 }
 0x100   : > { %522 = vst.msk [vmem:[%s1339_s4 + $0x58] sm:$0xff] %vm510_vm0, %v495_v24  ;;  %v481_v39 = vsel %vm478_vm13, %v480_v31, %v476_v37  ;;  %v500_v47 = vadd.f32 %v978_v30, %v499_v43  ;;  %530 = sbr.rel (!%p1190_p8) target bundleno = 321 (0x141), region = 40 }
 0x101   : > { %521 = vst.msk [vmem:[%s1339_s4 + $0x50] sm:$0xff] %vm510_vm0, %v481_v39  ;;  %v462_v45 = vsel %vm461_vm2, %v976_v22, %v458_v40 }
 0x102   : > { %v467_v46 = vsel %vm464_vm4, %v466_v42, %v462_v45  ;;  %v504_v49 = vsel %vm503_vm6, %v978_v30, %v500_v47 }
 0x103   : > { %520 = vst.msk [vmem:[%s1339_s4 + $0x48] sm:$0xff] %vm510_vm0, %v467_v46  ;;  %v509_v50 = vsel %vm506_vm7, %v508_v48, %v504_v49 }
 0x104   : > { %523 = vst.msk [vmem:[%s1339_s4 + $0x60] sm:$0xff] %vm510_vm0, %v509_v50 }
 0x105   : > { %s1566_s9 = smov (!%p533_p7, %s532_s9), 13 }
 0x106   : > { %s810_s28 = sshll.u32 %s1566_s9, 3 }
 0x107   : > { %p813_p11 = scmp.eq.s32.totalorder %s810_s28, 0 }
 0x108   : > { %979 = sdivrem.u32 (!%p813_p11), %s1566_s9, 13 }
 0x109   : > { %541 = sbr.rel (%p813_p11) target bundleno = 321 (0x141), region = 44 }
 0x111   : > { %s1452_s23 = spop.drf %979 }
 0x112   : > { %s981_s29 = spop.drf %979  ;;  %p814_p8 = scmp.le.s32.totalorder %s1452_s23, 0 }
 0x113   : > { %s1554_s2 = smov (!%p814_p8), %s1446_s26  ;;  %s1555_s30 = smov (!%p814_p8), %s1339_s4 }
 0x114   : > { %754 = sbr.rel (%p814_p8) target bundleno = 295 (0x127), region = 126  ;;  %s1461_s5 = smov (!%p814_p8), 0  }
 0x115   : > { %s1463_s7 = smov (!%p814_p8), 0  }
 0x119 LB: >> { %v630_v51 = vld [vmem:[%s1098_s30] sm:$0xff]  ;;  %v632_v52 = vld [vmem:[%s1098_s30 + $0x8] sm:$0xff]  ;;  %v634_v53 = vld [vmem:[%s1098_s30 + $0x10] sm:$0xff]  ;;  %s656_s10 = sadd.s32 1, %s1102_s5  ;;  %s624_s7 = sadd.s32 1, %s1106_s7   ;;  %s1106_s7 = sphi %s1463_s7, %s624_s7   ;;  %s1102_s5 = sphi %s1461_s5, %s1558_s5   ;;  %s1098_s30 = sphi %s1555_s30, %s1557_s30   ;;  %s1094_s2 = sphi %s1554_s2, %s1556_s2  }
 0x11a   : >> { %631 = vst [vmem:[%s1094_s2] sm:$0xff] %v630_v51  ;;  %v636_v54 = vld [vmem:[%s1098_s30 + $0x18] sm:$0xff]  ;;  %p657_p2 = scmp.ge.s32.totalorder %s656_s10, %s1452_s23  ;;  %v638_v55 = vld [vmem:[%s1098_s30 + $0x20] sm:$0xff]  ;;  %v640_v56 = vld [vmem:[%s1098_s30 + $0x28] sm:$0xff]  ;;  %p623_p3 = scmp.ge.s32.totalorder %s624_s7, %s1452_s23 }
 0x11b   : >> { %633 = vst [vmem:[%s1094_s2 + $0x8] sm:$0xff] %v632_v52  ;;  %v642_v57 = vld [vmem:[%s1098_s30 + $0x30] sm:$0xff]  ;;  %v644_v59 = vld [vmem:[%s1098_s30 + $0x38] sm:$0xff]  ;;  %v646_v60 = vld [vmem:[%s1098_s30 + $0x40] sm:$0xff] }
 0x11c   : >> { %635 = vst [vmem:[%s1094_s2 + $0x10] sm:$0xff] %v634_v53  ;;  %s1568_s10 = smov (%p657_p2, %s656_s10), 0  ;;  %v648_v61 = vld [vmem:[%s1098_s30 + $0x48] sm:$0xff]  ;;  %v650_v58 = vld [vmem:[%s1098_s30 + $0x50] sm:$0xff]  ;;  %v652_v62 = vld [vmem:[%s1098_s30 + $0x58] sm:$0xff] }
 0x11d   : >> { %637 = vst [vmem:[%s1094_s2 + $0x18] sm:$0xff] %v636_v54  ;;  %s659_s11 = smul.u32 104, %s1568_s10  ;;  %v654_v63 = vld [vmem:[%s1098_s30 + $0x60] sm:$0xff]  ;;  %s1558_s5 = smov %s1568_s10 }
 0x11e   : >> { %639 = vst [vmem:[%s1094_s2 + $0x20] sm:$0xff] %v638_v55 }
 0x11f   : >> { %641 = vst [vmem:[%s1094_s2 + $0x28] sm:$0xff] %v640_v56  ;;  %s661_s12 = scalar_lea.vmem %s1339_s4, %s659_s11 [#allocation5]   ;;  %s662_s14 = scalar_lea.vmem %s1446_s26, %s659_s11  }
 0x120   : >> { %643 = vst [vmem:[%s1094_s2 + $0x30] sm:$0xff] %v642_v57  ;;  %s1557_s30 = smov %s661_s12 }
 0x121   : >> { %645 = vst [vmem:[%s1094_s2 + $0x38] sm:$0xff] %v644_v59 }
 0x122   : >> { %647 = vst [vmem:[%s1094_s2 + $0x40] sm:$0xff] %v646_v60  ;;  %626 = sbr.rel (!%p623_p3) target bundleno = 281 (0x119), region = 132 }
 0x123   : >> { %649 = vst [vmem:[%s1094_s2 + $0x48] sm:$0xff] %v648_v61 }
 0x124   : >> { %651 = vst [vmem:[%s1094_s2 + $0x50] sm:$0xff] %v650_v58 }
 0x125   : >> { %653 = vst [vmem:[%s1094_s2 + $0x58] sm:$0xff] %v652_v62 }
 0x126   : >> { %655 = vst [vmem:[%s1094_s2 + $0x60] sm:$0xff] %v654_v63  ;;  %s1556_s2 = smov %s662_s14 }
 0x127 PF: > { %982 = sdivrem.u32 %s1566_s9, 13 }
 0x128   : > { %s815_s19 = smul.u32 104, %s1452_s23 }
 0x12a   : > { %s1517_s20 = scalar_lea.vmem %s1339_s4, %s815_s19 [#allocation5]   ;;  %s669_s24 = scalar_lea.vmem %s1446_s26, %s815_s19  }
 0x130   : > { %s983_s17 = spop.drf %982 }
 0x131   : > { %s984_s27 = spop.drf %982 }
 0x132   : > { %p817_p4 = scmp.le.s32.totalorder %s984_s27, 0 }
 0x133   : > { %s1108_s22 = smov (!%p817_p4), %s669_s24   ;;  %s1112_s6 = smov (!%p817_p4), %s1517_s20  }
 0x134   : > { %768 = sbr.rel (%p817_p4) target bundleno = 321 (0x141), region = 137  ;;  %s1116_s8 = smov (!%p817_p4), 0  }
 0x135   : > { %s1120_s13 = smov (!%p817_p4), 0  }
 0x139 LB: >> { %v679_v0 = vld [vmem:[%s1114_s6] sm:$0xff]  ;;  %s681_s4 = sadd.s32 1, %s1118_s8  ;;  %s673_s13 = sadd.s32 1, %s1122_s13   ;;  %s1122_s13 = sphi %s1120_s13, %s673_s13   ;;  %s1118_s8 = sphi %s1116_s8, %s1117_s8   ;;  %s1114_s6 = sphi %s1112_s6, %s686_s6   ;;  %s1110_s22 = sphi %s1108_s22, %s687_s22  }
 0x13a   : >> { %680 = vst [vmem:[%s1110_s22] sm:$0xff] %v679_v0  ;;  %p682_p5 = scmp.ge.s32.totalorder %s681_s4, %s984_s27  ;;  %p672_p6 = scmp.ge.s32.totalorder %s673_s13, %s984_s27 }
 0x13c   : >> { %s1570_s4 = smov (%p682_p5, %s681_s4), 0  ;;  %675 = sbr.rel (!%p672_p6) target bundleno = 313 (0x139), region = 143 }
 0x13d   : >> { %s818_s9 = sshll.u32 %s1570_s4, 3  ;;  %s1117_s8 = smov %s1570_s4  }
 0x13e   : >> { %s686_s6 = scalar_lea.vmem %s1517_s20, %s818_s9 [#allocation5]   ;;  %s687_s22 = scalar_lea.vmem %s669_s24, %s818_s9  }
 0x141 PF: > { %p14_p9 = scmp.ge.s32.totalorder %s1172_s18, 4   ;;  %s1559_s14 = smov %s1082_s15 }
 0x142   : > { %s1560_s15 = smov %s1086_s16  ;;  %s1561_s16 = smov %s1182_s21 }
 0x143   : > { %s1562_s17 = smov %s1172_s18  ;;  %16 = sbr.rel (!%p14_p9) target bundleno = 5 (0x5), region = 154 }
 0x148   :  { %703 = vsyncpa [#allocation4], 1 }
 0x149   :  { %705 = vsyncpa [#allocation4 + $0x1], 1 }

</bundles_post_ra>
